<compile_context>
chip_gen: v5e
topology: v5e:2x2
jax: 0.10.0
libtpu: 0.0.40
codegen_flags: <defaults>
</compile_context>

<pallas_src>
import functools
import math

import jax
import jax.numpy as jnp
from jax.experimental import pallas as pl
from jax.experimental.pallas import tpu as pltpu

LANES = 128            # every fused layer is padded to 128 output lanes
NUM_FUSED_LAYERS = 5   # fc1, fc2, fc3, [fc1_adv|fc1_val], folded dueling head
BIAS_ROWS = 8          # per-layer bias block rows in the f32 bias slab
TM_MAX = 512           # batch tile (sweep candidate 512-1024)


# ----------------------------------------------------------------------------
# Kernel
# ----------------------------------------------------------------------------
def dueling_q_kernel(x_ref, w_ref, b_ref, out_ref, *, s_pad, out_w):
    """x_ref: (TM, s_pad) f32 states.  w_ref: (5*128, 128) bf16 packed weights.
    b_ref: (5*8, 128) f32 packed biases.  out_ref: (TM, out_w) f32 Q-values
    (cols [0, A) are real, cols [A, out_w) are zero)."""

    def fused_layer(h, idx, k_rows, relu):
        w = w_ref[idx * LANES:idx * LANES + k_rows, :]          # (k,128) bf16
        b = b_ref[idx * BIAS_ROWS:idx * BIAS_ROWS + 1, :]       # (1,128) f32
        y = jnp.dot(h.astype(jnp.bfloat16), w,
                    preferred_element_type=jnp.float32) + b      # f32 accum
        return jnp.maximum(y, 0.0) if relu else y                # f32 ReLU

    h = x_ref[...]                          # (TM, s_pad) f32
    h = fused_layer(h, 0, s_pad, True)      # fc1            -> cols [0,64)
    h = fused_layer(h, 1, LANES, True)      # fc2            -> cols [0,64)
    h = fused_layer(h, 2, LANES, True)      # fc3            -> cols [0,32)
    h = fused_layer(h, 3, LANES, True)      # [adv_h | val_h]-> cols [0,64)
    o = fused_layer(h, 4, LANES, False)     # folded dueling combine
    out_ref[...] = o[:, :out_w]


# ----------------------------------------------------------------------------
# Wrapper
# ----------------------------------------------------------------------------
def _round_up(x, m):
    return (x + m - 1) // m * m


def _choose_tiling(batch):
    """Pick (TM, B_pad).  Large batches get >=2 tiles (both v7x TCs)."""
    b8 = _round_up(batch, 8)
    if b8 <= 256:
        return b8, b8                               # single small tile
    if b8 <= 2 * TM_MAX:
        tm = _round_up((b8 + 1) // 2, 8)            # exactly two tiles
        return tm, _round_up(b8, tm)
    return TM_MAX, _round_up(b8, TM_MAX)


def dueling_q_forward(state, w_slab, b_slab, action_size):
    """state: (B, state_size) f32.  w_slab/b_slab: packed params (see pack_params)."""
    B, S = state.shape
    s_pad = _round_up(S, 16)            # bf16 sublane-tile aligned narrow input
    out_w = _round_up(action_size, 8)   # narrow output (lane-masked store is fine)
    TM, B_pad = _choose_tiling(B)

    # Explicit batch pad (rows are independent and sliced away); features are
    # padded only to s_pad (not 128), so HBM input traffic stays small.
    x = jnp.zeros((B_pad, s_pad), jnp.float32).at[:B, :S].set(state)

    out = pl.pallas_call(
        functools.partial(dueling_q_kernel, s_pad=s_pad, out_w=out_w),
        out_shape=jax.ShapeDtypeStruct((B_pad, out_w), jnp.float32),
        grid=(B_pad // TM,),
        in_specs=[
            pl.BlockSpec((TM, s_pad), lambda i: (i, 0)),                   # states
            pl.BlockSpec((NUM_FUSED_LAYERS * LANES, LANES),
                         lambda i: (0, 0)),                                # weights (resident)
            pl.BlockSpec((NUM_FUSED_LAYERS * BIAS_ROWS, LANES),
                         lambda i: (0, 0)),                                # biases (resident)
        ],
        out_specs=pl.BlockSpec((TM, out_w), lambda i: (i, 0)),
        compiler_params=pltpu.CompilerParams(
            dimension_semantics=("parallel",)),                            # v7x: 2 TCs
    )(x, w_slab, b_slab)

    return out[:B, :action_size]


# ----------------------------------------------------------------------------
# Parameter init (PyTorch nn.Linear default) and slab packing
# ----------------------------------------------------------------------------
def init_linear(key, fan_in, fan_out):
    kw, kb = jax.random.split(key)
    bound = 1.0 / math.sqrt(fan_in)
    w = jax.random.uniform(kw, (fan_in, fan_out), jnp.float32, -bound, bound)
    b = jax.random.uniform(kb, (1, fan_out), jnp.float32, -bound, bound)
    return w, b


def make_params(key, state_size, action_size):
    fc1, fc2, fc3, fc4 = 64, 64, 32, 32
    keys = jax.random.split(key, 7)
    p = {}
    p["w1"], p["b1"] = init_linear(keys[0], state_size, fc1)
    p["w2"], p["b2"] = init_linear(keys[1], fc1, fc2)
    p["w3"], p["b3"] = init_linear(keys[2], fc2, fc3)
    p["wa1"], p["ba1"] = init_linear(keys[3], fc3, fc4)
    p["wa2"], p["ba2"] = init_linear(keys[4], fc4, action_size)
    p["wv1"], p["bv1"] = init_linear(keys[5], fc3, fc4)
    p["wv2"], p["bv2"] = init_linear(keys[6], fc4, 1)
    return p


def pack_params(p, state_size, action_size):
    """Pack weights into a bf16 (5*128,128) slab and biases into a f32
    (5*8,128) slab.  The dueling heads are fused and the dueling combine is
    folded into the final layer's weights/bias."""
    assert _round_up(state_size, 16) <= LANES, "state_size must be <= 128"
    assert _round_up(action_size, 8) <= LANES, "action_size must be <= 128"
    assert action_size >= 1

    wslab = jnp.zeros((NUM_FUSED_LAYERS * LANES, LANES), jnp.float32)
    bslab = jnp.zeros((NUM_FUSED_LAYERS * BIAS_ROWS, LANES), jnp.float32)

    def put(wslab, bslab, idx, w, b, col_off=0):
        r, c = w.shape
        wslab = wslab.at[idx * LANES:idx * LANES + r,
                         col_off:col_off + c].set(w)
        bslab = bslab.at[idx * BIAS_ROWS,
                         col_off:col_off + b.shape[-1]].set(jnp.ravel(b))
        return wslab, bslab

    wslab, bslab = put(wslab, bslab, 0, p["w1"], p["b1"])
    wslab, bslab = put(wslab, bslab, 1, p["w2"], p["b2"])
    wslab, bslab = put(wslab, bslab, 2, p["w3"], p["b3"])
    # Fused head layer: columns [0,32) = advantage stream, [32,64) = value stream.
    wslab, bslab = put(wslab, bslab, 3, p["wa1"], p["ba1"], col_off=0)
    wslab, bslab = put(wslab, bslab, 3, p["wv1"], p["bv1"], col_off=32)

    # Folded final layer: q = val + adv - mean(adv) baked into the weights.
    #   W5[0:32, j]  = wa2[:, j] - mean_k(wa2[:, k])
    #   W5[32:64, j] = wv2                       (value broadcast to every action)
    #   b5[j]        = ba2[j] - mean(ba2) + bv2
    wa2 = p["wa2"]                               # (32, A)
    ba2 = jnp.ravel(p["ba2"])                    # (A,)
    wv2 = jnp.ravel(p["wv2"])                    # (32,)
    bv2 = p["bv2"][0, 0]                         # scalar
    wa2c = wa2 - jnp.mean(wa2, axis=1, keepdims=True)
    ba2c = ba2 - jnp.mean(ba2)
    base = 4 * LANES
    wslab = wslab.at[base:base + 32, :action_size].set(wa2c)
    wslab = wslab.at[base + 32:base + 64, :action_size].set(
        jnp.broadcast_to(wv2[:, None], (32, action_size)))
    bslab = bslab.at[4 * BIAS_ROWS, :action_size].set(ba2c + bv2)

    return wslab.astype(jnp.bfloat16), bslab


# ----------------------------------------------------------------------------
# Pure-JAX reference (matches the PyTorch forward exactly, in f32)
# ----------------------------------------------------------------------------
def reference_forward(state, p):
    x = jax.nn.relu(state @ p["w1"] + p["b1"])
    x = jax.nn.relu(x @ p["w2"] + p["b2"])
    x = jax.nn.relu(x @ p["w3"] + p["b3"])
    adv = jax.nn.relu(x @ p["wa1"] + p["ba1"])
    val = jax.nn.relu(x @ p["wv1"] + p["bv1"])
    adv = adv @ p["wa2"] + p["ba2"]
    val = val @ p["wv2"] + p["bv2"]              # (B, 1) broadcasts like .expand()
    return val + adv - adv.mean(axis=1, keepdims=True)


if __name__ == "__main__":
    state_size = 8
    action_size = 4

    key = jax.random.PRNGKey(0)
    kx1, kx2, kp = jax.random.split(key, 3)

    params = make_params(kp, state_size, action_size)
    w_slab, b_slab = pack_params(params, state_size, action_size)

    fwd = jax.jit(dueling_q_forward, static_argnums=3)

    # Small batch (single grid step).
    state = jax.random.normal(kx1, (2, state_size), dtype=jnp.float32)
    out = jax.block_until_ready(fwd(state, w_slab, b_slab, action_size))
    ref = reference_forward(state, params)
    assert out.shape == (2, action_size)
    # bf16 matmul operands (f32 accumulation) vs f32 reference -> loose tolerance.
    assert jnp.allclose(out, ref, atol=5e-2, rtol=5e-2), (out, ref)

    # Larger batch exercising the 2-tile grid (TM=152, grid=2) + padding path.
    state2 = jax.random.normal(kx2, (300, state_size), dtype=jnp.float32)
    out2 = jax.block_until_ready(fwd(state2, w_slab, b_slab, action_size))
    ref2 = reference_forward(state2, params)
    assert out2.shape == (300, action_size)
    assert jnp.allclose(out2, ref2, atol=5e-2, rtol=5e-2)

    print("KERNEL_OK")
</pallas_src>

<mosaic_0001>
module attributes {stable_mosaic.version = 11 : i64} {
  func.func @dueling_q_kernel(%arg0: i32, %arg1: memref<8x16xf32, #tpu.memory_space<vmem>>, %arg2: memref<640x128xbf16, #tpu.memory_space<vmem>>, %arg3: memref<40x128xf32, #tpu.memory_space<vmem>>, %arg4: memref<8x8xf32, #tpu.memory_space<vmem>>) attributes {dimension_semantics = [#tpu.dimension_semantics<parallel>], iteration_bounds = array<i64: 1>, scalar_prefetch = 0 : i64, scratch_operands = 0 : i64, tpu.core_type = #tpu.core_type<tc>, window_params = [{transform_indices = @transform_0, window_bounds = array<i64: 8, 16>}, {pipeline_mode = #tpu.pipeline_mode<synchronous>, transform_indices = @transform_1, window_bounds = array<i64: 640, 128>}, {pipeline_mode = #tpu.pipeline_mode<synchronous>, transform_indices = @transform_2, window_bounds = array<i64: 40, 128>}, {transform_indices = @transform_3, window_bounds = array<i64: 8, 8>}]} {
    %c0 = arith.constant 0 : index
    %c0_0 = arith.constant 0 : index
    %0 = vector.load %arg1[%c0, %c0_0] : memref<8x16xf32, #tpu.memory_space<vmem>>, vector<8x16xf32>
    %c0_1 = arith.constant 0 : index
    %c0_2 = arith.constant 0 : index
    %1 = vector.load %arg2[%c0_1, %c0_2] : memref<640x128xbf16, #tpu.memory_space<vmem>>, vector<16x128xbf16>
    %c0_3 = arith.constant 0 : index
    %c0_4 = arith.constant 0 : index
    %2 = vector.load %arg3[%c0_3, %c0_4] : memref<40x128xf32, #tpu.memory_space<vmem>>, vector<1x128xf32>
    %3 = arith.truncf %0 : vector<8x16xf32> to vector<8x16xbf16>
    %cst = arith.constant dense<0.000000e+00> : vector<8x128xf32>
    %4 = tpu.matmul %3, %1, %cst {dimension_numbers = #tpu.dot_dimension_numbers<[1], [0], [0], [1], [0, 0, 1, 1], [], []>} : vector<8x16xbf16>, vector<16x128xbf16>, vector<8x128xf32> -> vector<8x128xf32>
    %5 = vector.broadcast %2 : vector<1x128xf32> to vector<8x128xf32>
    %6 = arith.addf %4, %5 : vector<8x128xf32>
    %cst_5 = arith.constant 0.000000e+00 : f32
    %7 = vector.broadcast %cst_5 : f32 to vector<8x128xf32>
    %8 = arith.maximumf %6, %7 : vector<8x128xf32>
    %c128 = arith.constant 128 : index
    %c0_6 = arith.constant 0 : index
    %9 = vector.load %arg2[%c128, %c0_6] : memref<640x128xbf16, #tpu.memory_space<vmem>>, vector<128x128xbf16>
    %c8 = arith.constant 8 : index
    %c0_7 = arith.constant 0 : index
    %10 = vector.load %arg3[%c8, %c0_7] : memref<40x128xf32, #tpu.memory_space<vmem>>, vector<1x128xf32>
    %11 = arith.truncf %8 : vector<8x128xf32> to vector<8x128xbf16>
    %cst_8 = arith.constant dense<0.000000e+00> : vector<8x128xf32>
    %12 = tpu.matmul %11, %9, %cst_8 {dimension_numbers = #tpu.dot_dimension_numbers<[1], [0], [0], [1], [0, 0, 1, 1], [], []>} : vector<8x128xbf16>, vector<128x128xbf16>, vector<8x128xf32> -> vector<8x128xf32>
    %13 = vector.broadcast %10 : vector<1x128xf32> to vector<8x128xf32>
    %14 = arith.addf %12, %13 : vector<8x128xf32>
    %cst_9 = arith.constant 0.000000e+00 : f32
    %15 = vector.broadcast %cst_9 : f32 to vector<8x128xf32>
    %16 = arith.maximumf %14, %15 : vector<8x128xf32>
    %c256 = arith.constant 256 : index
    %c0_10 = arith.constant 0 : index
    %17 = vector.load %arg2[%c256, %c0_10] : memref<640x128xbf16, #tpu.memory_space<vmem>>, vector<128x128xbf16>
    %c16 = arith.constant 16 : index
    %c0_11 = arith.constant 0 : index
    %18 = vector.load %arg3[%c16, %c0_11] : memref<40x128xf32, #tpu.memory_space<vmem>>, vector<1x128xf32>
    %19 = arith.truncf %16 : vector<8x128xf32> to vector<8x128xbf16>
    %cst_12 = arith.constant dense<0.000000e+00> : vector<8x128xf32>
    %20 = tpu.matmul %19, %17, %cst_12 {dimension_numbers = #tpu.dot_dimension_numbers<[1], [0], [0], [1], [0, 0, 1, 1], [], []>} : vector<8x128xbf16>, vector<128x128xbf16>, vector<8x128xf32> -> vector<8x128xf32>
    %21 = vector.broadcast %18 : vector<1x128xf32> to vector<8x128xf32>
    %22 = arith.addf %20, %21 : vector<8x128xf32>
    %cst_13 = arith.constant 0.000000e+00 : f32
    %23 = vector.broadcast %cst_13 : f32 to vector<8x128xf32>
    %24 = arith.maximumf %22, %23 : vector<8x128xf32>
    %c384 = arith.constant 384 : index
    %c0_14 = arith.constant 0 : index
    %25 = vector.load %arg2[%c384, %c0_14] : memref<640x128xbf16, #tpu.memory_space<vmem>>, vector<128x128xbf16>
    %c24 = arith.constant 24 : index
    %c0_15 = arith.constant 0 : index
    %26 = vector.load %arg3[%c24, %c0_15] : memref<40x128xf32, #tpu.memory_space<vmem>>, vector<1x128xf32>
    %27 = arith.truncf %24 : vector<8x128xf32> to vector<8x128xbf16>
    %cst_16 = arith.constant dense<0.000000e+00> : vector<8x128xf32>
    %28 = tpu.matmul %27, %25, %cst_16 {dimension_numbers = #tpu.dot_dimension_numbers<[1], [0], [0], [1], [0, 0, 1, 1], [], []>} : vector<8x128xbf16>, vector<128x128xbf16>, vector<8x128xf32> -> vector<8x128xf32>
    %29 = vector.broadcast %26 : vector<1x128xf32> to vector<8x128xf32>
    %30 = arith.addf %28, %29 : vector<8x128xf32>
    %cst_17 = arith.constant 0.000000e+00 : f32
    %31 = vector.broadcast %cst_17 : f32 to vector<8x128xf32>
    %32 = arith.maximumf %30, %31 : vector<8x128xf32>
    %c512 = arith.constant 512 : index
    %c0_18 = arith.constant 0 : index
    %33 = vector.load %arg2[%c512, %c0_18] : memref<640x128xbf16, #tpu.memory_space<vmem>>, vector<128x128xbf16>
    %c32 = arith.constant 32 : index
    %c0_19 = arith.constant 0 : index
    %34 = vector.load %arg3[%c32, %c0_19] : memref<40x128xf32, #tpu.memory_space<vmem>>, vector<1x128xf32>
    %35 = arith.truncf %32 : vector<8x128xf32> to vector<8x128xbf16>
    %cst_20 = arith.constant dense<0.000000e+00> : vector<8x128xf32>
    %36 = tpu.matmul %35, %33, %cst_20 {dimension_numbers = #tpu.dot_dimension_numbers<[1], [0], [0], [1], [0, 0, 1, 1], [], []>} : vector<8x128xbf16>, vector<128x128xbf16>, vector<8x128xf32> -> vector<8x128xf32>
    %37 = vector.broadcast %34 : vector<1x128xf32> to vector<8x128xf32>
    %38 = arith.addf %36, %37 : vector<8x128xf32>
    %39 = vector.extract_strided_slice %38 {offsets = [0, 0], sizes = [8, 8], strides = [1, 1]} : vector<8x128xf32> to vector<8x8xf32>
    %c0_21 = arith.constant 0 : index
    %c0_22 = arith.constant 0 : index
    %40 = vector.load %arg4[%c0_21, %c0_22] : memref<8x8xf32, #tpu.memory_space<vmem>>, vector<8x8xf32>
    tpu.vector_store %arg4[%c0_21, %c0_22], %39 {strides = array<i32>} : memref<8x8xf32, #tpu.memory_space<vmem>>, vector<8x8xf32>,
    return
  }
  func.func @transform_0(%arg0: i32) -> (i32, i32) {
    %c0_i32 = arith.constant 0 : i32
    %c0_i32_0 = arith.constant 0 : i32
    return %arg0, %c0_i32 : i32, i32
  }
  func.func @transform_1(%arg0: i32) -> (i32, i32) {
    %c0_i32 = arith.constant 0 : i32
    %c0_i32_0 = arith.constant 0 : i32
    %c0_i32_1 = arith.constant 0 : i32
    return %c0_i32, %c0_i32_0 : i32, i32
  }
  func.func @transform_2(%arg0: i32) -> (i32, i32) {
    %c0_i32 = arith.constant 0 : i32
    %c0_i32_0 = arith.constant 0 : i32
    %c0_i32_1 = arith.constant 0 : i32
    return %c0_i32, %c0_i32_0 : i32, i32
  }
  func.func @transform_3(%arg0: i32) -> (i32, i32) {
    %c0_i32 = arith.constant 0 : i32
    %c0_i32_0 = arith.constant 0 : i32
    return %arg0, %c0_i32 : i32, i32
  }
}

</mosaic_0001>

<bundles_post_ra>
// kernel: dueling_q_forward.1
= control target key start
LH: loop header
LB: loop body
LE: loop exit
PB: predicated region body
PF: predicated region fallthrough
CT: control target
= control target key end

     0   :  { %8 = vsyncpa [#allocation3], 0  ;;  %s675_s0 = inlined_call_operand.vmem [shape: f32[8,16], index: 0, kind: input, shape index: {}]   ;;  %s676_s1 = inlined_call_operand.hbm [shape: bf16[640,128], index: 1, kind: input, shape index: {}]   ;;  %s677_s2 = inlined_call_operand.hbm [shape: f32[40,128], index: 2, kind: input, shape index: {}]   ;;  %s678_s3 = inlined_call_operand.vmem [shape: f32[8,8], index: 3, kind: output, shape index: {}]  }
   0x1   :  { %s16_s14 = sshll.u32 %s676_s1, 4  ;;  %s17_s14 = int_to_ptr.hbm [resolvable:$true] %s16_s14 }
   0x2   :  { %9 = vsyncpa [#allocation5], 0  ;;  %s637_s15 = smov [#allocation2]   ;;  %s29_s19 = sshll.u32 %s677_s2, 4  ;;  %s30_s19 = int_to_ptr.hbm [resolvable:$true] %s29_s19 }
   0x3   :  { %s18_s16 = sshll.u32 %s637_s15, 4  ;;  %s638_s20 = smov 64   ;;  %s19_s16 = int_to_ptr.vmem [resolvable:$true] %s18_s16 }
   0x4   :  { %s639_s21 = smov 4   ;;  %s640_s22 = smov [#allocation4]  }
   0x5   :  { %24 = dma.hbm_to_vmem [thread:$0]  %s17_s14, 5120, %s19_s16, [#allocation3], %s638_s20, %s638_s20, %s639_s21  }
   0x6   :  { %s31_s23 = sshll.u32 %s640_s22, 4  ;;  %s641_s24 = smov 128   ;;  %s32_s23 = int_to_ptr.vmem [resolvable:$true] %s31_s23 }
   0x7   :  { %s642_s25 = smov 8  }
   0x8   :  { %37 = dma.hbm_to_vmem [thread:$0]  %s30_s19, 640, %s32_s23, [#allocation5], %s641_s24, %s641_s24, %s642_s25  }
   0x9   :  { %633 = dma.done.wait [#allocation3], 5120  }
   0xa   :  { %634 = vsyncadd [#allocation3], 4294962176 }
   0xb   :  { %635 = dma.done.wait [#allocation5], 640  }
   0xc   :  { %636 = vsyncadd [#allocation5], 4294966656  ;;  %v541_v0 = vld [vmem:[#allocation2] sm:$0xff]  ;;  %v549_v2 = vld [vmem:[#allocation2 + $0x78] sm:$0xff]  ;;  %vm59_vm0 = vcmask 130048   ;;  %vm400_vm1 = vcmask 64512  }
   0xd   :  { %v47_v1 = vld [vmem:[%s675_s0] sm:$0xff]  ;;  %70 = vmatpush.bf16.msra.mxu0 %v541_v0  ;;  %144 = vmatpush.bf16.msra.mxu1 %v549_v2  ;;  %v548_v4 = vld [vmem:[#allocation2 + $0x70] sm:$0xff]  ;;  %v547_v5 = vld [vmem:[#allocation2 + $0x68] sm:$0xff] }
   0xe   :  { %v51_v3 = vpack.c.bf16 %v47_v1, %v47_v1  ;;  %v546_v6 = vld [vmem:[#allocation2 + $0x60] sm:$0xff]  ;;  %v545_v7 = vld [vmem:[#allocation2 + $0x58] sm:$0xff]  ;;  %v544_v8 = vld [vmem:[#allocation2 + $0x50] sm:$0xff] }
   0xf   :  { %v543_v9 = vld [vmem:[#allocation2 + $0x48] sm:$0xff]  ;;  %v542_v10 = vld [vmem:[#allocation2 + $0x40] sm:$0xff]  ;;  %v557_v11 = vld [vmem:[#allocation2 + $0xb8] sm:$0xff] }
  0x10   :  { %412 = vmatmul.msk.bf16.vlgmr.msra.gmra.mxu0 %vm59_vm0, %v51_v3  ;;  %225 = vmatpush.bf16.msra.mxu2 %v557_v11  ;;  %v556_v12 = vld [vmem:[#allocation2 + $0xb0] sm:$0xff]  ;;  %v555_v13 = vld [vmem:[#allocation2 + $0xa8] sm:$0xff]  ;;  %v554_v14 = vld [vmem:[#allocation2 + $0xa0] sm:$0xff] }
  0x11   :  { %145 = vmatpush.bf16.msra.mxu1 %v548_v4  ;;  %v553_v15 = vld [vmem:[#allocation2 + $0x98] sm:$0xff]  ;;  %v552_v16 = vld [vmem:[#allocation2 + $0x90] sm:$0xff]  ;;  %v580_v17 = vld [vmem:[#allocation4] ss:$0 sm:$0xff] }
  0x12   :  { %v551_v23 = vld [vmem:[#allocation2 + $0x88] sm:$0xff]  ;;  %v550_v24 = vld [vmem:[#allocation2 + $0x80] sm:$0xff]  ;;  %v565_v25 = vld [vmem:[#allocation2 + $0xf8] sm:$0xff] }
  0x13   :  { %306 = vmatpush.bf16.msra.mxu3 %v565_v25  ;;  %v564_v26 = vld [vmem:[#allocation2 + $0xf0] sm:$0xff]  ;;  %v563_v27 = vld [vmem:[#allocation2 + $0xe8] sm:$0xff]  ;;  %v562_v28 = vld [vmem:[#allocation2 + $0xe0] sm:$0xff] }
  0x14   :  { %226 = vmatpush.bf16.msra.mxu2 %v556_v12  ;;  %v561_v29 = vld [vmem:[#allocation2 + $0xd8] sm:$0xff]  ;;  %v560_v30 = vld [vmem:[#allocation2 + $0xd0] sm:$0xff]  ;;  %v581_v31 = vld [vmem:[#allocation4 + $0x8] ss:$0 sm:$0xff] }
  0x15   :  { %146 = vmatpush.bf16.msra.mxu1 %v547_v5  ;;  %v559_v37 = vld [vmem:[#allocation2 + $0xc8] sm:$0xff]  ;;  %v558_v38 = vld [vmem:[#allocation2 + $0xc0] sm:$0xff]  ;;  %v573_v39 = vld [vmem:[#allocation2 + $0x138] sm:$0xff] }
  0x16   :  { %387 = vmatpush.bf16.msrb.mxu0 %v573_v39  ;;  %v572_v40 = vld [vmem:[#allocation2 + $0x130] sm:$0xff]  ;;  %v571_v41 = vld [vmem:[#allocation2 + $0x128] sm:$0xff]  ;;  %v570_v42 = vld [vmem:[#allocation2 + $0x120] sm:$0xff] }
  0x17   :  { %307 = vmatpush.bf16.msra.mxu3 %v564_v26  ;;  %v569_v43 = vld [vmem:[#allocation2 + $0x118] sm:$0xff]  ;;  %v568_v44 = vld [vmem:[#allocation2 + $0x110] sm:$0xff]  ;;  %v567_v51 = vld [vmem:[#allocation2 + $0x108] sm:$0xff] }
  0x18   :  { %227 = vmatpush.bf16.msra.mxu2 %v555_v13  ;;  %v582_v45 = vld [vmem:[#allocation4 + $0x10] ss:$0 sm:$0xff]  ;;  %v566_v52 = vld [vmem:[#allocation2 + $0x100] sm:$0xff]  ;;  %v583_v53 = vld [vmem:[#allocation4 + $0x18] ss:$0 sm:$0xff] }
  0x19   :  { %147 = vmatpush.bf16.msra.mxu1 %v546_v6  ;;  %v584_v59 = vld [vmem:[#allocation4 + $0x20] ss:$0 sm:$0xff] }
  0x1a   :  { %388 = vmatpush.bf16.msrb.mxu0 %v572_v40 }
  0x1b   :  { %308 = vmatpush.bf16.msra.mxu3 %v563_v27 }
  0x1c   :  { %228 = vmatpush.bf16.msra.mxu2 %v554_v14 }
  0x1d   :  { %148 = vmatpush.bf16.msra.mxu1 %v545_v7 }
  0x1e   :  { %389 = vmatpush.bf16.msrb.mxu0 %v571_v41 }
  0x1f   :  { %309 = vmatpush.bf16.msra.mxu3 %v562_v28 }
  0x20   :  { %229 = vmatpush.bf16.msra.mxu2 %v553_v15 }
  0x21   :  { %149 = vmatpush.bf16.msra.mxu1 %v544_v8 }
  0x22   :  { %390 = vmatpush.bf16.msrb.mxu0 %v570_v42 }
  0x23   :  { %310 = vmatpush.bf16.msra.mxu3 %v561_v29 }
  0x24   :  { %230 = vmatpush.bf16.msra.mxu2 %v552_v16 }
  0x25   :  { %150 = vmatpush.bf16.msra.mxu1 %v543_v9 }
  0x26   :  { %391 = vmatpush.bf16.msrb.mxu0 %v569_v43 }
  0x27   :  { %311 = vmatpush.bf16.msra.mxu3 %v560_v30 }
  0x28   :  { %231 = vmatpush.bf16.msra.mxu2 %v551_v23 }
  0x29   :  { %151 = vmatpush.bf16.msra.mxu1 %v542_v10 }
  0x2a   :  { %392 = vmatpush.bf16.msrb.mxu0 %v568_v44 }
  0x2b   :  { %312 = vmatpush.bf16.msra.mxu3 %v559_v37 }
  0x2c   :  { %232 = vmatpush.bf16.msra.mxu2 %v550_v24 }
  0x2e   :  { %393 = vmatpush.bf16.msrb.mxu0 %v567_v51 }
  0x2f   :  { %313 = vmatpush.bf16.msra.mxu3 %v558_v38 }
  0x32   :  { %394 = vmatpush.bf16.msrb.mxu0 %v566_v52 }
  0x8d   :  { %v72_v18 = vpop.f32.mrf.mxu0 }
  0x8e   :  { %v73_v19 = vadd.f32 %v580_v17, %v72_v18 }
  0x90   :  { %v76_v20 = vmax.f32 %v73_v19, 0.0 }
  0x92   :  { %v94_v21 = vpack.c.bf16 %v76_v20, %v76_v20 }
  0x94   :  { %152 = vmatmul.bf16.vlgmr.msra.gmra.mxu1 %v94_v21 }
  0x95   :  { %v74_v22 = vpop.f32.mrf.mxu0 }
 0x111   :  { %v153_v32 = vpop.f32.mrf.mxu1 }
 0x112   :  { %v154_v33 = vadd.f32 %v581_v31, %v153_v32 }
 0x114   :  { %v157_v34 = vmax.f32 %v154_v33, 0.0 }
 0x116   :  { %v175_v35 = vpack.c.bf16 %v157_v34, %v157_v34 }
 0x118   :  { %233 = vmatmul.bf16.vlgmr.msra.gmra.mxu2 %v175_v35 }
 0x119   :  { %v155_v36 = vpop.f32.mrf.mxu1 }
 0x19b   :  { %v234_v46 = vpop.f32.mrf.mxu2 }
 0x19c   :  { %v235_v47 = vadd.f32 %v582_v45, %v234_v46 }
 0x19e   :  { %v238_v48 = vmax.f32 %v235_v47, 0.0 }
 0x1a0   :  { %v256_v49 = vpack.c.bf16 %v238_v48, %v238_v48 }
 0x1a2   :  { %314 = vmatmul.bf16.vlgmr.msra.gmra.mxu3 %v256_v49 }
 0x1a3   :  { %v236_v50 = vpop.f32.mrf.mxu2 }
 0x225   :  { %v315_v54 = vpop.f32.mrf.mxu3 }
 0x226   :  { %v316_v55 = vadd.f32 %v583_v53, %v315_v54 }
 0x228   :  { %v319_v56 = vmax.f32 %v316_v55, 0.0 }
 0x22a   :  { %v337_v57 = vpack.c.bf16 %v319_v56, %v319_v56 }
 0x22c   :  { %395 = vmatmul.bf16.vlgmr.msrb.gmra.mxu0 %v337_v57 }
 0x22d   :  { %v317_v58 = vpop.f32.mrf.mxu3 }
 0x2a9   :  { %v396_v60 = vpop.f32.mrf.mxu0 }
 0x2aa   :  { %v397_v61 = vadd.f32 %v584_v59, %v396_v60 }
 0x2ac   :  { %401 = vst.msk [vmem:[%s678_s3] sm:$0xff] %vm400_vm1, %v397_v61 }
 0x2b1   :  { %v398_v62 = vpop.f32.mrf.mxu0 }
 0x2b2   :  { %406 = vsyncpa [#allocation3], 1 }
 0x2b3   :  { %407 = vsyncpa [#allocation5], 1 }

</bundles_post_ra>
